<compile_context>
chip_gen: v5e
topology: v5e:2x2
jax: 0.10.0
libtpu: 0.0.40
codegen_flags: <defaults>
</compile_context>

<pallas_src>
import jax
import jax.numpy as jnp
from jax import lax
from jax.experimental import pallas as pl
from jax.experimental.pallas import tpu as pltpu


def _embedding_kernel(x_ref, pos_ref, segb_ref, segd_ref, mask_ref,
                      gamma_ref, beta_ref, o_ref):
    # All statistics / normalization in f32 regardless of I/O dtype.
    x = x_ref[0].astype(jnp.float32)            # (TS, D)
    pos = pos_ref[...].astype(jnp.float32)      # (TS, D)
    m = mask_ref[0]                             # (TS, 1) f32, values in {0,1}

    # segment embedding lookup as an FMA between the two table rows
    seg = segb_ref[...] + m * segd_ref[...]     # (1,D) + (TS,1)*(1,D) -> (TS,D)

    emb = x + pos + seg                         # (TS, D) f32

    # LayerNorm over last dim (eps matches torch.nn.LayerNorm default).
    # Single-pass: two independent reductions, var = E[x^2] - mean^2 >= 0.
    eps = 1e-5
    inv_d = 1.0 / emb.shape[-1]
    s1 = jnp.sum(emb, axis=-1, keepdims=True)
    s2 = jnp.sum(emb * emb, axis=-1, keepdims=True)
    mean = s1 * inv_d
    var = jnp.maximum(s2 * inv_d - mean * mean, 0.0)
    normed = (emb - mean) * lax.rsqrt(var + eps)

    out = normed * gamma_ref[...] + beta_ref[...]      # (TS,D)*(1,D)+(1,D)
    o_ref[0] = out.astype(o_ref.dtype)


def _vmem_budget_bytes():
    """3/4 of physical VMEM (capped): ~48 MiB on v7x, ~96 MiB on v5e/v6e."""
    phys = 64 << 20
    try:
        info = pltpu.get_tpu_info()
        phys = int(getattr(info, "vmem_capacity_bytes", phys))
    except Exception:
        pass
    return min(phys * 3 // 4, 96 << 20)


def _pick_seq_tile(S, D, itemsize, target_bytes):
    """Largest multiple-of-8 divisor of S whose (TS, D) tile stays under
    target_bytes; falls back to a multiple of 8 (or full S) so the (8,128)
    block constraint is always respected."""
    if S * D * itemsize <= target_bytes:
        return S
    best = None
    for ts in range(8, S, 8):
        if S % ts == 0 and ts * D * itemsize <= target_bytes:
            best = ts
    if best is not None:
        return best
    # Fallback: smallest multiple-of-8 divisor (valid block shape even if it
    # exceeds the target); otherwise use the full sequence.
    for ts in range(8, S, 8):
        if S % ts == 0:
            return ts
    return S


def embedding_layer(x, segment_mask, pos_table, seg_table, gamma, beta):
    """x: (B, S, D) float, segment_mask: (B, S) int in {0,1},
    pos_table: (max_len, D), seg_table: (2, D), gamma/beta: (D,)."""
    B, S, D = x.shape
    itemsize = jnp.dtype(x.dtype).itemsize

    vmem_budget = _vmem_budget_bytes()
    target_bytes = (8 << 20) if vmem_budget > (48 << 20) else (4 << 20)
    TS = _pick_seq_tile(S, D, itemsize, target_bytes)
    n_s_tiles = S // TS

    # arange(S) gather on the position table == a contiguous slice.
    pos_slice = pos_table[:S].astype(x.dtype)                     # (S, D)
    # Segment lookup as FMA: row0 + mask * (row1 - row0); mask must be {0,1}.
    seg_f32 = seg_table.astype(jnp.float32)
    seg_base = seg_f32[0:1, :]                                    # (1, D) f32
    seg_diff = (seg_f32[1, :] - seg_f32[0, :]).reshape(1, D)      # (1, D) f32
    maskf = segment_mask.astype(jnp.float32).reshape(B, S, 1)     # (B, S, 1)
    gamma2 = gamma.reshape(1, D).astype(jnp.float32)
    beta2 = beta.reshape(1, D).astype(jnp.float32)

    # Pipeline footprint: double-buffered x/out/pos tiles (I/O dtype) plus the
    # in-kernel f32 emb/normed intermediates, mask tile, and the tiny params.
    tile_bytes = TS * D * itemsize
    f32_tile = TS * D * 4
    approx = 6 * tile_bytes + 2 * f32_tile + 2 * TS * 4 + 8 * D * 4
    vmem_limit = int(min(max(2 * approx, 32 << 20), vmem_budget))

    return pl.pallas_call(
        _embedding_kernel,
        out_shape=jax.ShapeDtypeStruct((B, S, D), x.dtype),
        grid_spec=pltpu.PrefetchScalarGridSpec(
            num_scalar_prefetch=0,
            # Seq tiles outer (sharded across TCs), batch inner: the pos tile's
            # block index is constant across the inner B loop, so its DMA is
            # skipped after the first step of each seq tile.
            grid=(n_s_tiles, B),
            in_specs=[
                pl.BlockSpec((1, TS, D), lambda s, b: (b, s, 0)),   # x tile
                pl.BlockSpec((TS, D), lambda s, b: (s, 0)),         # pos tile
                pl.BlockSpec((1, D), lambda s, b: (0, 0)),          # seg base
                pl.BlockSpec((1, D), lambda s, b: (0, 0)),          # seg diff
                pl.BlockSpec((1, TS, 1), lambda s, b: (b, s, 0)),   # mask tile
                pl.BlockSpec((1, D), lambda s, b: (0, 0)),          # gamma
                pl.BlockSpec((1, D), lambda s, b: (0, 0)),          # beta
            ],
            out_specs=pl.BlockSpec((1, TS, D), lambda s, b: (b, s, 0)),
        ),
        compiler_params=pltpu.CompilerParams(
            dimension_semantics=("parallel", "parallel"),
            vmem_limit_bytes=vmem_limit),
    )(x, pos_slice, seg_base, seg_diff, maskf, gamma2, beta2)


def embedding_layer_ref(x, segment_mask, pos_table, seg_table, gamma, beta):
    """Pure-JAX reference (two-pass LayerNorm) for verification."""
    B, S, D = x.shape
    pos = jnp.arange(S)
    emb = x + pos_table[pos][None, :, :] + seg_table[segment_mask]
    mean = jnp.mean(emb, axis=-1, keepdims=True)
    var = jnp.mean((emb - mean) ** 2, axis=-1, keepdims=True)
    return (emb - mean) / jnp.sqrt(var + 1e-5) * gamma + beta


if __name__ == "__main__":
    # small shapes consistent with the module's forward
    B, S, D = 2, 8, 32
    MAX_LEN = 16

    key = jax.random.PRNGKey(0)
    k_x, k_pos, k_seg, k_mask = jax.random.split(key, 4)

    x = jax.random.normal(k_x, (B, S, D), dtype=jnp.float32)
    segment_mask = jax.random.randint(k_mask, (B, S), 0, 2, dtype=jnp.int32)

    # deterministic parameter init (nn.Embedding ~ N(0,1), LayerNorm gamma=1/beta=0)
    pos_table = jax.random.normal(k_pos, (MAX_LEN, D), dtype=jnp.float32)
    seg_table = jax.random.normal(k_seg, (2, D), dtype=jnp.float32)
    gamma = jnp.ones((D,), dtype=jnp.float32)
    beta = jnp.zeros((D,), dtype=jnp.float32)

    out = embedding_layer(x, segment_mask, pos_table, seg_table, gamma, beta)
    out = jax.block_until_ready(out)

    ref = embedding_layer_ref(x, segment_mask, pos_table, seg_table, gamma, beta)
    assert out.shape == (B, S, D)
    assert jnp.allclose(out, ref, atol=1e-4, rtol=1e-4), "mismatch vs reference"

    print("KERNEL_OK")
</pallas_src>

<mosaic_0001>
module attributes {stable_mosaic.version = 11 : i64} {
  func.func @_embedding_kernel(%arg0: i32, %arg1: i32, %arg2: memref<1x8x32xf32, #tpu.memory_space<vmem>>, %arg3: memref<8x32xf32, #tpu.memory_space<vmem>>, %arg4: memref<1x32xf32, #tpu.memory_space<vmem>>, %arg5: memref<1x32xf32, #tpu.memory_space<vmem>>, %arg6: memref<1x8x1xf32, #tpu.memory_space<vmem>>, %arg7: memref<1x32xf32, #tpu.memory_space<vmem>>, %arg8: memref<1x32xf32, #tpu.memory_space<vmem>>, %arg9: memref<1x8x32xf32, #tpu.memory_space<vmem>>) attributes {dimension_semantics = [#tpu.dimension_semantics<parallel>, #tpu.dimension_semantics<parallel>], iteration_bounds = array<i64: 1, 2>, scalar_prefetch = 0 : i64, scratch_operands = 0 : i64, tpu.core_type = #tpu.core_type<tc>, window_params = [{transform_indices = @transform_0, window_bounds = array<i64: 1, 8, 32>}, {transform_indices = @transform_1, window_bounds = array<i64: 8, 32>}, {pipeline_mode = #tpu.pipeline_mode<synchronous>, transform_indices = @transform_2, window_bounds = array<i64: 1, 32>}, {pipeline_mode = #tpu.pipeline_mode<synchronous>, transform_indices = @transform_3, window_bounds = array<i64: 1, 32>}, {transform_indices = @transform_4, window_bounds = array<i64: 1, 8, 1>}, {pipeline_mode = #tpu.pipeline_mode<synchronous>, transform_indices = @transform_5, window_bounds = array<i64: 1, 32>}, {pipeline_mode = #tpu.pipeline_mode<synchronous>, transform_indices = @transform_6, window_bounds = array<i64: 1, 32>}, {transform_indices = @transform_7, window_bounds = array<i64: 1, 8, 32>}]} {
    %c0 = arith.constant 0 : index
    %c0_0 = arith.constant 0 : index
    %c0_1 = arith.constant 0 : index
    %0 = vector.load %arg2[%c0, %c0_0, %c0_1] : memref<1x8x32xf32, #tpu.memory_space<vmem>>, vector<1x8x32xf32>
    %1 = vector.shape_cast %0 : vector<1x8x32xf32> to vector<8x32xf32>
    %c0_2 = arith.constant 0 : index
    %c0_3 = arith.constant 0 : index
    %2 = vector.load %arg3[%c0_2, %c0_3] : memref<8x32xf32, #tpu.memory_space<vmem>>, vector<8x32xf32>
    %c0_4 = arith.constant 0 : index
    %c0_5 = arith.constant 0 : index
    %c0_6 = arith.constant 0 : index
    %3 = vector.load %arg6[%c0_4, %c0_5, %c0_6] : memref<1x8x1xf32, #tpu.memory_space<vmem>>, vector<1x8x1xf32>
    %4 = vector.shape_cast %3 : vector<1x8x1xf32> to vector<8x1xf32>
    %c0_7 = arith.constant 0 : index
    %c0_8 = arith.constant 0 : index
    %5 = vector.load %arg4[%c0_7, %c0_8] : memref<1x32xf32, #tpu.memory_space<vmem>>, vector<1x32xf32>
    %c0_9 = arith.constant 0 : index
    %c0_10 = arith.constant 0 : index
    %6 = vector.load %arg5[%c0_9, %c0_10] : memref<1x32xf32, #tpu.memory_space<vmem>>, vector<1x32xf32>
    %7 = vector.broadcast %4 : vector<8x1xf32> to vector<8x32xf32>
    %8 = vector.broadcast %6 : vector<1x32xf32> to vector<8x32xf32>
    %9 = arith.mulf %7, %8 : vector<8x32xf32>
    %10 = vector.broadcast %5 : vector<1x32xf32> to vector<8x32xf32>
    %11 = arith.addf %10, %9 : vector<8x32xf32>
    %12 = arith.addf %1, %2 : vector<8x32xf32>
    %13 = arith.addf %12, %11 : vector<8x32xf32>
    %cst = arith.constant dense<0.000000e+00> : vector<8xf32>
    %14 = vector.multi_reduction <add>, %13, %cst [1] : vector<8x32xf32> to vector<8xf32>
    %15 = vector.shape_cast %14 : vector<8xf32> to vector<8x1xf32>
    %16 = arith.mulf %13, %13 : vector<8x32xf32>
    %cst_11 = arith.constant dense<0.000000e+00> : vector<8xf32>
    %17 = vector.multi_reduction <add>, %16, %cst_11 [1] : vector<8x32xf32> to vector<8xf32>
    %18 = vector.shape_cast %17 : vector<8xf32> to vector<8x1xf32>
    %cst_12 = arith.constant 3.125000e-02 : f32
    %19 = vector.broadcast %cst_12 : f32 to vector<8x1xf32>
    %20 = arith.mulf %15, %19 : vector<8x1xf32>
    %cst_13 = arith.constant 3.125000e-02 : f32
    %21 = vector.broadcast %cst_13 : f32 to vector<8x1xf32>
    %22 = arith.mulf %18, %21 : vector<8x1xf32>
    %23 = arith.mulf %20, %20 : vector<8x1xf32>
    %24 = arith.subf %22, %23 : vector<8x1xf32>
    %cst_14 = arith.constant 0.000000e+00 : f32
    %25 = vector.broadcast %cst_14 : f32 to vector<8x1xf32>
    %26 = arith.maximumf %24, %25 : vector<8x1xf32>
    %27 = vector.broadcast %20 : vector<8x1xf32> to vector<8x32xf32>
    %28 = arith.subf %13, %27 : vector<8x32xf32>
    %cst_15 = arith.constant 9.99999974E-6 : f32
    %29 = vector.broadcast %cst_15 : f32 to vector<8x1xf32>
    %30 = arith.addf %26, %29 : vector<8x1xf32>
    %31 = math.rsqrt %30 : vector<8x1xf32>
    %32 = vector.broadcast %31 : vector<8x1xf32> to vector<8x32xf32>
    %33 = arith.mulf %28, %32 : vector<8x32xf32>
    %c0_16 = arith.constant 0 : index
    %c0_17 = arith.constant 0 : index
    %34 = vector.load %arg7[%c0_16, %c0_17] : memref<1x32xf32, #tpu.memory_space<vmem>>, vector<1x32xf32>
    %35 = vector.broadcast %34 : vector<1x32xf32> to vector<8x32xf32>
    %36 = arith.mulf %33, %35 : vector<8x32xf32>
    %c0_18 = arith.constant 0 : index
    %c0_19 = arith.constant 0 : index
    %37 = vector.load %arg8[%c0_18, %c0_19] : memref<1x32xf32, #tpu.memory_space<vmem>>, vector<1x32xf32>
    %38 = vector.broadcast %37 : vector<1x32xf32> to vector<8x32xf32>
    %39 = arith.addf %36, %38 : vector<8x32xf32>
    %c0_20 = arith.constant 0 : index
    %c0_21 = arith.constant 0 : index
    %c0_22 = arith.constant 0 : index
    %40 = vector.load %arg9[%c0_20, %c0_21, %c0_22] : memref<1x8x32xf32, #tpu.memory_space<vmem>>, vector<1x8x32xf32>
    %41 = vector.shape_cast %40 : vector<1x8x32xf32> to vector<8x32xf32>
    %42 = vector.shape_cast %39 : vector<8x32xf32> to vector<1x8x32xf32>
    tpu.vector_store %arg9[%c0_20, %c0_21, %c0_22], %42 {strides = array<i32>} : memref<1x8x32xf32, #tpu.memory_space<vmem>>, vector<1x8x32xf32>,
    return
  }
  func.func @transform_0(%arg0: i32, %arg1: i32) -> (i32, i32, i32) {
    %c0_i32 = arith.constant 0 : i32
    %c0_i32_0 = arith.constant 0 : i32
    return %arg1, %arg0, %c0_i32 : i32, i32, i32
  }
  func.func @transform_1(%arg0: i32, %arg1: i32) -> (i32, i32) {
    %c0_i32 = arith.constant 0 : i32
    %c0_i32_0 = arith.constant 0 : i32
    return %arg0, %c0_i32 : i32, i32
  }
  func.func @transform_2(%arg0: i32, %arg1: i32) -> (i32, i32) {
    %c0_i32 = arith.constant 0 : i32
    %c0_i32_0 = arith.constant 0 : i32
    %c0_i32_1 = arith.constant 0 : i32
    return %c0_i32, %c0_i32_0 : i32, i32
  }
  func.func @transform_3(%arg0: i32, %arg1: i32) -> (i32, i32) {
    %c0_i32 = arith.constant 0 : i32
    %c0_i32_0 = arith.constant 0 : i32
    %c0_i32_1 = arith.constant 0 : i32
    return %c0_i32, %c0_i32_0 : i32, i32
  }
  func.func @transform_4(%arg0: i32, %arg1: i32) -> (i32, i32, i32) {
    %c0_i32 = arith.constant 0 : i32
    %c0_i32_0 = arith.constant 0 : i32
    return %arg1, %arg0, %c0_i32 : i32, i32, i32
  }
  func.func @transform_5(%arg0: i32, %arg1: i32) -> (i32, i32) {
    %c0_i32 = arith.constant 0 : i32
    %c0_i32_0 = arith.constant 0 : i32
    %c0_i32_1 = arith.constant 0 : i32
    return %c0_i32, %c0_i32_0 : i32, i32
  }
  func.func @transform_6(%arg0: i32, %arg1: i32) -> (i32, i32) {
    %c0_i32 = arith.constant 0 : i32
    %c0_i32_0 = arith.constant 0 : i32
    %c0_i32_1 = arith.constant 0 : i32
    return %c0_i32, %c0_i32_0 : i32, i32
  }
  func.func @transform_7(%arg0: i32, %arg1: i32) -> (i32, i32, i32) {
    %c0_i32 = arith.constant 0 : i32
    %c0_i32_0 = arith.constant 0 : i32
    return %arg1, %arg0, %c0_i32 : i32, i32, i32
  }
}

</mosaic_0001>

<bundles_post_ra>
// kernel: tpu_custom_call.1
= control target key start
LH: loop header
LB: loop body
LE: loop exit
PB: predicated region body
PF: predicated region fallthrough
CT: control target
= control target key end

     0   :  { %12 = vsyncpa [#allocation3], 0  ;;  %s885_s0 = inlined_call_operand.vmem [shape: f32[2,8,32], index: 0, kind: input, shape index: {}]   ;;  %s886_s1 = inlined_call_operand.hbm [shape: f32[8,32], index: 1, kind: input, shape index: {}]   ;;  %s887_s2 = inlined_call_operand.vmem [shape: f32[1,32], index: 2, kind: input, shape index: {}]   ;;  %s888_s3 = inlined_call_operand.vmem [shape: f32[1,32], index: 3, kind: input, shape index: {}]   ;;  %s889_s4 = inlined_call_operand.vmem [shape: f32[2,8,1], index: 4, kind: input, shape index: {}]   ;;  %s890_s5 = inlined_call_operand.vmem [shape: f32[1,32], index: 5, kind: input, shape index: {}]   ;;  %s891_s6 = inlined_call_operand.vmem [shape: f32[1,32], index: 6, kind: input, shape index: {}]   ;;  %s892_s7 = inlined_call_operand.hbm [shape: f32[2,8,32], index: 7, kind: output, shape index: {}]  }
   0x1   :  { %13 = vsyncpa [#allocation4], 0 }
   0x2   :  { %15 = vsyncpa [#allocation4 + $0x1], 0  ;;  %s767_s24 = smov 0   ;;  %s769_s25 = smov 0  }
   0x3   :  { %s771_s26 = smov 0   ;;  %s773_s27 = smov 0  }
   0x4   :  { %s775_s28 = smov 0   ;;  %s777_s29 = smov 0  }
   0x5 LB: > { %s523_s30 = sadd.s32 4294967295, %s723_s29   ;;  %s524_s8 = sadd.s32 4294967294, %s723_s29   ;;  %s723_s29 = sphi %s777_s29, %s21_s29   ;;  %s719_s28 = sphi %s775_s28, %s899_s28   ;;  %s715_s27 = sphi %s773_s27, %s898_s27   ;;  %s711_s26 = sphi %s771_s26, %s897_s26   ;;  %s707_s25 = sphi %s769_s25, %s896_s25   ;;  %s703_s24 = sphi %s767_s24, %s895_s24  }
   0x6   : > { %s30_s9 = sadd.s32 1, %s719_s28  ;;  %s208_s10 = sadd.s32 1, %s711_s26 }
   0x7   : > { %p31_p0 = scmp.ge.s32.totalorder %s30_s9, 2  ;;  %p218_p1 = scmp.ne.s32.totalorder %s711_s26, %s707_s25 }
   0x8   : > { %p219_p2 = scmp.eq.s32.totalorder %s523_s30, 1  ;;  %p224_p3 = scmp.ne.s32.totalorder %s707_s25, %s703_s24 }
   0x9   : > { %s901_s9 = smov (%p31_p0, %s30_s9), 0  ;;  %p225_p5 = scmp.eq.s32.totalorder %s524_s8, 1 }
   0xa   : > { %p807_p4 = por %p219_p2, %p218_p1  ;;  %s203_s12 = ssub.s32 %s719_s28, %s901_s9 }
   0xb   : > { %p525_p6 = scmp.ge.s32.totalorder %s723_s29, 1  ;;  %p206_p7 = scmp.eq.s32.totalorder %s203_s12, 0 }
   0xc   : > { %p814_p8 = por %p225_p5, %p224_p3  ;;  %p232_p9 = scmp.lt.s32.totalorder %s723_s29, 3 }
   0xd   : > { %s820_s14 = scalar_select %p206_p7, %s711_s26, %s208_s10  }
   0xe   : > { %p233_p10 = pnand %p525_p6, %p232_p9  ;;  %p551_p11 = scmp.eq.s32.totalorder %s523_s30, 0 }
   0xf   : > { %s246_s17 = sshll.u32 %s886_s1, 4  ;;  %s725_s18 = smov [#allocation2]   ;;  %s247_s17 = int_to_ptr.hbm [resolvable:$true] %s246_s17 }
  0x10   : > { %p543_p12 = pneg %p233_p10  ;;  %s248_s19 = sshll.u32 %s725_s18, 4  ;;  %s249_s19 = int_to_ptr.vmem [resolvable:$true] %s248_s19 }
  0x11   : > { %293 = sbr.rel (%p233_p10) target bundleno = 305 (0x131), region = 48 }
  0x12   : > { %p544_p13 = pnand %p551_p11, %p543_p12 }
  0x14   : > { %546 = dma.hbm_to_vmem [thread:$0]  (!%p544_p13), %s247_s17, 128, %s249_s19, [#allocation3]  }
  0x16   : > { %694 = dma.done.wait (%p551_p11), [#allocation3], 128  }
  0x17   : > { %696 = vsyncadd (%p551_p11), [#allocation3], 4294967168  ;;  %p335_p0 = scmp.lt.s32.totalorder %s715_s27, 1  ;;  %v726_v0 = vmov 0   ;;  %v605_v2 = vld [vmem:[%s888_s3] ss:$0 sm:$0xff] }
  0x18   : > { %604 = vset.pattern.permute.xlu0 %v726_v0  ;;  %v350_v4 = vld [vmem:[#allocation2] sm:$0xff]  ;;  %vm369_vm0 = vcmask 261120   ;;  %s332_s19 = sand.u32 1, %s707_s25  }
  0x19   : > { %s336_s20 = scalar_select %p335_p0, %s715_s27, 1  ;;  %v606_v5 = vld [vmem:[%s887_s2] ss:$0 sm:$0xff] }
  0x1a   : > { %v607_v29 = vld [vmem:[%s890_s5] ss:$0 sm:$0xff]  ;;  %s407_s18 = scalar_lea.sflag [#allocation4], %s332_s19 }
  0x1b   : > { %s531_s21 = sshll.u32 %s336_s20, 3  ;;  %s530_s20 = sshll.u32 %s332_s19, 3  ;;  %v608_v32 = vld [vmem:[%s891_s6] ss:$0 sm:$0xff] }
  0x1c   : > { %s348_s30 = scalar_lea.vmem %s889_s4, %s531_s21  ;;  %s341_s12 = scalar_lea.vmem %s885_s0, %s531_s21 }
  0x1d   : > { %v351_v1 = vld [vmem:[%s348_s30] sm:$0xff]  ;;  %s534_s21 = sshll.u32 %s715_s27, 3  ;;  %s334_s27 = scalar_lea.vmem [#allocation5], %s530_s20 }
  0x1e   : > { %356 = vperm.xlu0 %604, %v351_v1   ;;  %v349_v3 = vld [vmem:[%s341_s12] sm:$0xff]  ;;  %s418_s10 = scalar_lea.hbm %s892_s7, %s534_s21  ;;  %s420_s16 = sshll.u32 %s334_s27, 4  ;;  %s421_s16 = int_to_ptr.vmem [resolvable:$true] %s420_s16 }
  0x1f   : > { %v367_v7 = vadd.f32 %v350_v4, %v349_v3  ;;  %s422_s17 = sshll.u32 %s418_s10, 4  ;;  %s661_s20 = scalar_lea.hbm %s892_s7, 16  ;;  %s423_s17 = int_to_ptr.hbm [resolvable:$true] %s422_s17 }
  0x20   : > { %s655_s22 = sshra.s32 %s423_s17, 4  ;;  %s656_s22 = int_to_ptr.hbm [resolvable:$true] %s655_s22 }
  0x21   : > { %s657_s21 = scalar_lea.hbm %s656_s22, 8  ;;  %p662_p5 = scmp.lt.s32.totalorder %s656_s22, %s892_s7 }
  0x22   : > { %p658_p1 = scmp.ne.s32.totalorder %s656_s22, %s657_s21  ;;  %p663_p6 = scmp.lt.s32.totalorder %s661_s20, %s657_s21 }
  0x24   : > { %p659_p2 = pnand %p658_p1, %p807_p4  ;;  %p664_p7 = por %p663_p6, %p662_p5 }
  0x26   : > { %p660_p3 = pneg %p659_p2 }
  0x28   : > { %p665_p9 = pnand %p664_p7, %p660_p3 }
  0x90   : > { %v357_v6 = vpop.permute.xlu0 %356 }
  0x91   : > { %v362_v8 = vmul.f32 %v605_v2, %v357_v6 }
  0x93   : > { %v366_v9 = vadd.f32 %v606_v5, %v362_v8 }
  0x95   : > { %v368_v10 = vadd.f32 %v367_v7, %v366_v9 }
  0x97   : > { %v370_v11 = vsel %vm369_vm0, %v368_v10, 0.0  ;;  %v373_v12 = vmul.f32 %v368_v10, %v368_v10 }
  0x98   : > { %371 = vadd.xlane.f32.xlu0 %v370_v11 }
  0x99   : > { %v374_v13 = vsel %vm369_vm0, %v373_v12, 0.0 }
  0x9a   : > { %375 = vadd.xlane.f32.xlu1 %v374_v13 }
 0x10b   : > { %v372_v14 = vpop.xlane.xlu0 %371 }
 0x10c   : > { %v377_v15 = vmul.f32 0.03125, %v372_v14 }
 0x10d   : > { %v376_v16 = vpop.xlane.xlu1 %375 }
 0x10e   : > { %v379_v17 = vmul.f32 %v377_v15, %v377_v15  ;;  %v378_v18 = vmul.f32 0.03125, %v376_v16  ;;  %v382_v28 = vsub.f32 %v368_v10, %v377_v15 }
 0x110   : > { %v380_v19 = vsub.f32 %v378_v18, %v379_v17 }
 0x112   : > { %v381_v20 = vmax.f32 %v380_v19, 0.0 }
 0x114   : > { %v383_v21 = vadd.f32 1e-05, %v381_v20 }
 0x116   : > { %609 = vrsqrt.f32 %v383_v21  ;;  %vm390_vm2 = vweird.f32 %v383_v21 }
 0x11c   : > { %v610_v22 = vpop.eup %609 }
 0x11d   : > { %v385_v23 = vmul.f32 %v610_v22, %v383_v21  ;;  %vm391_vm1 = vweird.f32 %v610_v22 }
 0x11e   : > { %vm392_vm3 = vmor %vm390_vm2, %vm391_vm1 }
 0x11f   : > { %v386_v24 = vmul.f32 %v610_v22, %v385_v23 }
 0x121   : > { %v387_v25 = vmul.f32 0.5, %v386_v24 }
 0x123   : > { %v388_v26 = vsub.f32 1.5, %v387_v25 }
 0x125   : > { %v389_v27 = vmul.f32 %v610_v22, %v388_v26 }
 0x127   : > { %v393_v30 = vsel %vm392_vm3, %v610_v22, %v389_v27 }
 0x128   : > { %v394_v31 = vmul.f32 %v393_v30, %v382_v28 }
 0x12a   : > { %v399_v33 = vmul.f32 %v607_v29, %v394_v31 }
 0x12c   : > { %v404_v34 = vadd.f32 %v608_v32, %v399_v33 }
 0x12e   : > { %405 = vst.msk [vmem:[%s334_s27] sm:$0xff] %vm369_vm0, %v404_v34 }
 0x12f   : > { %668 = shalt.err (!%p665_p9)
}
 0x130   : > { %541 = dma.vmem_to_hbm [thread:$0]  (%p807_p4), %s421_s16, 128, %s423_s17, %s407_s18  }
 0x131 PF: > { %p553_p10 = scmp.ge.s32.totalorder %s723_s29, 2  ;;  %s434_s19 = sand.u32 1, %s703_s24  }
 0x132   : > { %s435_s12 = scalar_lea.sflag [#allocation4], %s434_s19 }
 0x133   : > { %p548_p11 = pnand %p553_p10, %p814_p8 }
 0x135   : > { %p549_p12 = pneg %p548_p11 }
 0x137   : > { %698 = dma.done.wait (%p549_p12), %s435_s12, 128  }
 0x138   : > { %700 = vsyncadd (%p549_p12), %s435_s12, 4294967168  ;;  %s21_s29 = sadd.s32 1, %s723_s29   ;;  %s895_s24 = smov %s707_s25 }
 0x139   : > { %p18_p13 = scmp.ge.s32.totalorder %s21_s29, 4   ;;  %s896_s25 = smov %s711_s26 }
 0x13a   : > { %s897_s26 = smov %s820_s14  ;;  %s898_s27 = smov %s719_s28 }
 0x13b   : > { %s899_s28 = smov %s901_s9  ;;  %20 = sbr.rel (!%p18_p13) target bundleno = 5 (0x5), region = 92 }
 0x140   :  { %441 = vsyncpa [#allocation3], 1 }
 0x141   :  { %443 = vsyncpa [#allocation3 + $0x1], 1 }
 0x142   :  { %444 = vsyncpa [#allocation4], 1 }
 0x143   :  { %446 = vsyncpa [#allocation4 + $0x1], 1 }

</bundles_post_ra>
